<compile_context>
chip_gen: v6e
topology: v6e:2x2x1
jax: 0.10.0
libtpu: 0.0.40
codegen_flags: <defaults>
</compile_context>

<pallas_src>
import functools

import jax
import jax.numpy as jnp
from jax.experimental import pallas as pl
from jax.experimental.pallas import tpu as pltpu


def ext_attn_kernel(q_ref, wk_ref, wv_ref, o_ref, acc_ref, *maybe_rowsum,
                    resident_weights, rowsum_col):
    # q_ref   : (Bt, N, Dp) bf16     input rows for this batch block
    # wk_ref  : (nS|1, Dp, tS) bf16  mk weight, S-tile-major
    # wv_ref  : (nS|1, tS, Dp) bf16  mv weight, S-tile-major
    # o_ref   : (Bt, N, Dp)          output block (written on the last S step)
    # acc_ref : (Bt*N, Dp) f32       running sum over S of softmax(qk) @ Wv
    # maybe_rowsum: ((Bt*N,1) f32,)  only when the all-ones Wv column is off
    s = pl.program_id(1)
    bt, n, dp = q_ref.shape
    # Resident weights are indexed by the S-tile id; streamed weights always
    # hold tile 0.  Static index when only one tile exists.
    if (not resident_weights) or wk_ref.shape[0] == 1:
        w_idx = 0
    else:
        w_idx = s

    @pl.when(s == 0)
    def _init():
        acc_ref[...] = jnp.zeros_like(acc_ref)
        if rowsum_col < 0:
            maybe_rowsum[0][...] = jnp.zeros_like(maybe_rowsum[0])

    # ---- first matmul: (Bt*N, Dp) @ (Dp, tS); bf16 operands, f32 accumulate.
    q2d = q_ref[...].reshape(bt * n, dp)
    attn = jnp.dot(q2d, wk_ref[w_idx],
                   preferred_element_type=jnp.float32)            # (Bt*N, tS)

    # ---- softmax over the N axis (PyTorch dim=1).  Every S column is
    # independent, so tiling over S does not change the softmax result.
    ts = attn.shape[-1]
    a3 = attn.reshape(bt, n, ts)
    m = jnp.max(a3, axis=1, keepdims=True)
    e = jnp.exp(a3 - m)                                           # f32 (v5e-safe)
    colsum = jnp.sum(e, axis=1, keepdims=True)
    p = e * pl.reciprocal(colsum, approx=True)                    # (Bt, N, tS)
    p2d = p.reshape(bt * n, ts)

    # ---- hoisted L1 normalization: accumulate the second matmul; the row sums
    # come for free from the all-ones Wv column (or a VPU sum as fallback).
    if rowsum_col < 0:
        maybe_rowsum[0][...] += jnp.sum(p2d, axis=1, keepdims=True)
    acc_ref[...] += jnp.dot(p2d.astype(wv_ref.dtype), wv_ref[w_idx],
                            preferred_element_type=jnp.float32)

    # ---- finalize: scale by 1/rowsum, cast, lane-dense store.
    @pl.when(s == pl.num_programs(1) - 1)
    def _finalize():
        acc = acc_ref[...]
        if rowsum_col >= 0:
            rowsum = acc[:, rowsum_col:rowsum_col + 1]            # (Bt*N, 1)
        else:
            rowsum = maybe_rowsum[0][...]
        out2d = acc * pl.reciprocal(rowsum)                       # exact recip
        o_ref[...] = out2d.reshape(bt, n, dp).astype(o_ref.dtype)


def _round_up(x, m):
    return (x + m - 1) // m * m


def _tpu_info():
    """(per-core VMEM bytes, has multiple TensorCores per chip)."""
    kind = ""
    try:
        kind = jax.devices()[0].device_kind.lower()
    except Exception:
        pass
    multi_tc = ("v7" in kind) or ("7x" in kind)
    vmem = None
    try:
        vmem = int(pltpu.get_tpu_info().vmem_capacity_bytes)
    except Exception:
        pass
    if vmem is None:
        vmem = (64 << 20) if multi_tc else (128 << 20)
    return vmem, multi_tc


def _choose_batch_block(B, N, max_bt, target_rows=1024):
    bt = 1
    for cand in range(1, max_bt + 1):
        if B % cand == 0 and cand * N <= target_rows:
            bt = cand
    return bt


def _choose_s_tile(S, max_tile):
    if S <= max_tile:
        return S
    # Prefer multiples of 256 (fills 2x256x256 MXU tiles on v6e/v7x), then 128.
    for step in (256, 128):
        t = (max_tile // step) * step
        while t >= step:
            if S % t == 0:
                return t
            t -= step
    return S  # fallback: no S tiling


def _vmem_bytes(rows, dp, ts, S, resident, ones_col, out_bytes):
    q_blk = 2 * rows * dp * 2                    # double-buffered bf16 input
    o_blk = 2 * rows * dp * out_bytes            # double-buffered output
    if resident:
        w_blk = 2 * 2 * dp * S * 2               # full bf16 wk+wv (x2 buffers)
    else:
        w_blk = 2 * 2 * dp * ts * 2              # per-step bf16 tiles, x2 buffers
    acc = rows * dp * 4
    rowsum = 0 if ones_col else rows * 128 * 4   # lane-padded (rows, 1) f32
    interm = 4 * rows * ts * 4                   # attn / e / p live f32 copies
    return q_blk + o_blk + w_blk + acc + rowsum + interm


def external_attention(queries, wk, wv, *, batch_block=None, s_tile=None):
    """queries: (B, N, d_model); wk: (d_model, S); wv: (S, d_model)."""
    B, N, d_model = queries.shape
    S = wk.shape[1]
    assert wk.shape == (d_model, S) and wv.shape == (S, d_model)
    out_dtype = queries.dtype
    out_bytes = jnp.dtype(out_dtype).itemsize

    vmem_cap, multi_tc = _tpu_info()
    small_vmem = vmem_cap < (96 << 20)           # v7x: 64 MiB/TC; v5e/v6e: 128 MiB
    budget = (24 << 20) if small_vmem else (48 << 20)
    vmem_cap_limit = (48 << 20) if small_vmem else (100 << 20)
    resident_cap = (14 << 20) if small_vmem else (32 << 20)

    # Lane-dense padding of the model dim (exact: padded Wk rows / Wv cols = 0).
    d_pad = _round_up(d_model, 128)
    ones_col = d_pad > d_model
    if d_pad != d_model:
        queries = jnp.pad(queries, ((0, 0), (0, 0), (0, d_pad - d_model)))
        wk = jnp.pad(wk, ((0, d_pad - d_model), (0, 0)))
        wv = jnp.pad(wv, ((0, 0), (0, d_pad - d_model)))
        # One padded Wv column of ones -> the second matmul also produces the
        # L1 row sums (free on the MXU), read back at column `d_model`.
        wv = wv.at[:, d_model].set(1.0)

    # bf16 at the HBM boundary; accumulation / softmax stay f32 in the kernel.
    queries = queries.astype(jnp.bfloat16)
    wk = wk.astype(jnp.bfloat16)
    wv = wv.astype(jnp.bfloat16)

    # TODO(synk): if N is not a multiple of 8 (sublane pack), pad N and mask the
    # padded rows to -inf before the softmax to keep reshapes view-only.

    tS = s_tile or _choose_s_tile(S, max_tile=(1024 if small_vmem else 2048))
    max_bt = max(1, B // 2) if multi_tc else B   # keep >=2 parallel blocks on v7x
    Bt = batch_block or _choose_batch_block(B, N, max_bt, target_rows=1024)

    resident = 2 * d_pad * S * 2 <= resident_cap  # full bf16 wk+wv footprint

    def fits(bt, ts, res):
        return _vmem_bytes(bt * N, d_pad, ts, S, res, ones_col, out_bytes) <= budget

    while not fits(Bt, tS, resident):
        if tS % 256 == 0 and S % (tS // 2) == 0:
            tS //= 2
        elif Bt > 1:
            Bt = max(d for d in range(1, Bt) if B % d == 0)
        elif resident:
            resident = False
        else:
            break
    assert B % Bt == 0 and S % tS == 0
    nS = S // tS

    # S-tile-major weight layout: wk3[s] is the (Dp, tS) tile, wv3[s] the
    # (tS, Dp) tile.  Resident mode keeps the whole stack in VMEM (constant
    # block index -> single fetch); streaming mode DMAs one tile per step.
    wk3 = wk.reshape(d_pad, nS, tS).transpose(1, 0, 2)
    wv3 = wv.reshape(nS, tS, d_pad)

    if resident:
        wk_spec = pl.BlockSpec((nS, d_pad, tS), lambda b, s: (0, 0, 0))
        wv_spec = pl.BlockSpec((nS, tS, d_pad), lambda b, s: (0, 0, 0))
    else:
        wk_spec = pl.BlockSpec((1, d_pad, tS), lambda b, s: (s, 0, 0))
        wv_spec = pl.BlockSpec((1, tS, d_pad), lambda b, s: (s, 0, 0))

    scratch_shapes = [pltpu.VMEM((Bt * N, d_pad), jnp.float32)]
    if not ones_col:
        scratch_shapes.append(pltpu.VMEM((Bt * N, 1), jnp.float32))

    est = _vmem_bytes(Bt * N, d_pad, tS, S, resident, ones_col, out_bytes)
    vmem_limit = int(min(max(2 * est, 32 << 20), vmem_cap_limit))

    grid = (B // Bt, nS)
    weight_passes = 1 if resident else grid[0]
    flops = 4 * B * N * S * d_pad                # two matmuls
    transcendentals = B * N * S                  # exp
    bytes_accessed = int(queries.size * 2
                         + weight_passes * (wk3.size + wv3.size) * 2
                         + B * N * d_pad * out_bytes)

    kernel = functools.partial(
        ext_attn_kernel,
        resident_weights=resident,
        rowsum_col=(d_model if ones_col else -1),
    )

    out = pl.pallas_call(
        kernel,
        out_shape=jax.ShapeDtypeStruct((B, N, d_pad), out_dtype),
        grid=grid,
        in_specs=[
            pl.BlockSpec((Bt, N, d_pad), lambda b, s: (b, 0, 0)),
            wk_spec,
            wv_spec,
        ],
        out_specs=pl.BlockSpec((Bt, N, d_pad), lambda b, s: (b, 0, 0)),
        scratch_shapes=scratch_shapes,
        compiler_params=pltpu.CompilerParams(
            dimension_semantics=("parallel", "arbitrary"),
            vmem_limit_bytes=vmem_limit,
        ),
        cost_estimate=pl.CostEstimate(
            flops=int(flops),
            transcendentals=int(transcendentals),
            bytes_accessed=bytes_accessed,
        ),
    )(queries, wk3, wv3)

    return out[..., :d_model] if d_pad != d_model else out


def reference(queries, wk, wv):
    attn = jnp.einsum("bnd,ds->bns", queries, wk)
    attn = jax.nn.softmax(attn, axis=1)
    attn = attn / jnp.sum(attn, axis=2, keepdims=True)
    return jnp.einsum("bns,sd->bnd", attn, wv)


if __name__ == "__main__":
    B, N, d_model, S = 2, 8, 32, 64

    key = jax.random.PRNGKey(0)
    kq, kk, kv = jax.random.split(key, 3)

    queries = jax.random.normal(kq, (B, N, d_model), dtype=jnp.float32)
    # nn.Linear default init U(-1/sqrt(fan_in), 1/sqrt(fan_in)); weights stored
    # pre-transposed so both matmuls are plain A @ B.
    wk = jax.random.uniform(kk, (d_model, S), minval=-1.0, maxval=1.0,
                            dtype=jnp.float32) / jnp.sqrt(d_model)
    wv = jax.random.uniform(kv, (S, d_model), minval=-1.0, maxval=1.0,
                            dtype=jnp.float32) / jnp.sqrt(S)

    out = external_attention(queries, wk, wv)
    out = jax.block_until_ready(out)

    ref = reference(queries, wk, wv)
    assert out.shape == (B, N, d_model)
    # bf16 MXU operands + approx softmax reciprocal -> compare against the pure
    # f32 reference with a correspondingly relaxed tolerance.
    err = float(jnp.max(jnp.abs(out - ref)))
    assert jnp.allclose(out, ref, atol=1e-2, rtol=1e-2), f"max abs err = {err}"

    print("KERNEL_OK")
</pallas_src>

<mosaic_0001>
module attributes {stable_mosaic.version = 11 : i64} {
  func.func @ext_attn_kernel(%arg0: i32, %arg1: i32, %arg2: memref<2x8x128xbf16, #tpu.memory_space<vmem>>, %arg3: memref<1x128x64xbf16, #tpu.memory_space<vmem>>, %arg4: memref<1x64x128xbf16, #tpu.memory_space<vmem>>, %arg5: memref<2x8x128xf32, #tpu.memory_space<vmem>>, %arg6: memref<16x128xf32, #tpu.memory_space<vmem>>) attributes {dimension_semantics = [#tpu.dimension_semantics<parallel>, #tpu.dimension_semantics<arbitrary>], iteration_bounds = array<i64: 1, 1>, scalar_prefetch = 0 : i64, scratch_operands = 1 : i64, tpu.core_type = #tpu.core_type<tc>, window_params = [{transform_indices = @transform_0, window_bounds = array<i64: 2, 8, 128>}, {pipeline_mode = #tpu.pipeline_mode<synchronous>, transform_indices = @transform_1, window_bounds = array<i64: 1, 128, 64>}, {pipeline_mode = #tpu.pipeline_mode<synchronous>, transform_indices = @transform_2, window_bounds = array<i64: 1, 64, 128>}, {transform_indices = @transform_3, window_bounds = array<i64: 2, 8, 128>}]} {
    %c0_i32 = arith.constant 0 : i32
    %0 = arith.cmpi eq, %arg1, %c0_i32 : i32
    %1 = arith.extui %0 : i1 to i32
    %c0_i32_0 = arith.constant 0 : i32
    %2 = arith.cmpi ne, %1, %c0_i32_0 : i32
    scf.if %2 {
      %cst_18 = arith.constant 0.000000e+00 : f32
      %30 = vector.broadcast %cst_18 : f32 to vector<16x128xf32>
      %c0_19 = arith.constant 0 : index
      %c0_20 = arith.constant 0 : index
      %31 = vector.load %arg6[%c0_19, %c0_20] : memref<16x128xf32, #tpu.memory_space<vmem>>, vector<16x128xf32>
      tpu.vector_store %arg6[%c0_19, %c0_20], %30 {strides = array<i32>} : memref<16x128xf32, #tpu.memory_space<vmem>>, vector<16x128xf32>,
    } else {
    }
    %c0 = arith.constant 0 : index
    %c0_1 = arith.constant 0 : index
    %c0_2 = arith.constant 0 : index
    %3 = vector.load %arg2[%c0, %c0_1, %c0_2] : memref<2x8x128xbf16, #tpu.memory_space<vmem>>, vector<2x8x128xbf16>
    %4 = vector.shape_cast %3 : vector<2x8x128xbf16> to vector<16x128xbf16>
    %c0_3 = arith.constant 0 : index
    %c0_4 = arith.constant 0 : index
    %c0_5 = arith.constant 0 : index
    %5 = vector.load %arg3[%c0_3, %c0_4, %c0_5] : memref<1x128x64xbf16, #tpu.memory_space<vmem>>, vector<1x128x64xbf16>
    %6 = vector.shape_cast %5 : vector<1x128x64xbf16> to vector<128x64xbf16>
    %cst = arith.constant dense<0.000000e+00> : vector<16x64xf32>
    %7 = tpu.matmul %4, %6, %cst {dimension_numbers = #tpu.dot_dimension_numbers<[1], [0], [0], [1], [0, 0, 1, 1], [], []>} : vector<16x128xbf16>, vector<128x64xbf16>, vector<16x64xf32> -> vector<16x64xf32>
    %8 = vector.shape_cast %7 : vector<16x64xf32> to vector<2x8x64xf32>
    %cst_6 = arith.constant dense<0xFF800000> : vector<2x64xf32>
    %9 = vector.multi_reduction <maximumf>, %8, %cst_6 [1] : vector<2x8x64xf32> to vector<2x64xf32>
    %10 = vector.shape_cast %9 : vector<2x64xf32> to vector<2x1x64xf32>
    %11 = vector.broadcast %10 : vector<2x1x64xf32> to vector<2x8x64xf32>
    %12 = arith.subf %8, %11 : vector<2x8x64xf32>
    %13 = math.exp %12 : vector<2x8x64xf32>
    %cst_7 = arith.constant dense<0.000000e+00> : vector<2x64xf32>
    %14 = vector.multi_reduction <add>, %13, %cst_7 [1] : vector<2x8x64xf32> to vector<2x64xf32>
    %15 = vector.shape_cast %14 : vector<2x64xf32> to vector<2x1x64xf32>
    %16 = tpu.reciprocal %15 {approx = true} : vector<2x1x64xf32> -> vector<2x1x64xf32>
    %17 = vector.broadcast %16 : vector<2x1x64xf32> to vector<2x8x64xf32>
    %18 = arith.mulf %13, %17 : vector<2x8x64xf32>
    %19 = vector.shape_cast %18 : vector<2x8x64xf32> to vector<16x64xf32>
    %c0_8 = arith.constant 0 : index
    %c0_9 = arith.constant 0 : index
    %20 = vector.load %arg6[%c0_8, %c0_9] : memref<16x128xf32, #tpu.memory_space<vmem>>, vector<16x128xf32>
    %21 = arith.truncf %19 : vector<16x64xf32> to vector<16x64xbf16>
    %c0_10 = arith.constant 0 : index
    %c0_11 = arith.constant 0 : index
    %c0_12 = arith.constant 0 : index
    %22 = vector.load %arg4[%c0_10, %c0_11, %c0_12] : memref<1x64x128xbf16, #tpu.memory_space<vmem>>, vector<1x64x128xbf16>
    %23 = vector.shape_cast %22 : vector<1x64x128xbf16> to vector<64x128xbf16>
    %cst_13 = arith.constant dense<0.000000e+00> : vector<16x128xf32>
    %24 = tpu.matmul %21, %23, %cst_13 {dimension_numbers = #tpu.dot_dimension_numbers<[1], [0], [0], [1], [0, 0, 1, 1], [], []>} : vector<16x64xbf16>, vector<64x128xbf16>, vector<16x128xf32> -> vector<16x128xf32>
    %25 = arith.addf %20, %24 : vector<16x128xf32>
    %c0_14 = arith.constant 0 : index
    %c0_15 = arith.constant 0 : index
    %26 = vector.load %arg6[%c0_14, %c0_15] : memref<16x128xf32, #tpu.memory_space<vmem>>, vector<16x128xf32>
    tpu.vector_store %arg6[%c0_14, %c0_15], %25 {strides = array<i32>} : memref<16x128xf32, #tpu.memory_space<vmem>>, vector<16x128xf32>,
    %c0_i32_16 = arith.constant 0 : i32
    %27 = arith.cmpi eq, %arg1, %c0_i32_16 : i32
    %28 = arith.extui %27 : i1 to i32
    %c0_i32_17 = arith.constant 0 : i32
    %29 = arith.cmpi ne, %28, %c0_i32_17 : i32
    scf.if %29 {
      %c0_18 = arith.constant 0 : index
      %c0_19 = arith.constant 0 : index
      %30 = vector.load %arg6[%c0_18, %c0_19] : memref<16x128xf32, #tpu.memory_space<vmem>>, vector<16x128xf32>
      %31 = vector.extract_strided_slice %30 {offsets = [0, 32], sizes = [16, 1], strides = [1, 1]} : vector<16x128xf32> to vector<16x1xf32>
      %32 = tpu.reciprocal %31 : vector<16x1xf32> -> vector<16x1xf32>
      %33 = vector.broadcast %32 : vector<16x1xf32> to vector<16x128xf32>
      %34 = arith.mulf %30, %33 : vector<16x128xf32>
      %35 = vector.shape_cast %34 : vector<16x128xf32> to vector<2x8x128xf32>
      %c0_20 = arith.constant 0 : index
      %c0_21 = arith.constant 0 : index
      %c0_22 = arith.constant 0 : index
      %36 = vector.load %arg5[%c0_20, %c0_21, %c0_22] : memref<2x8x128xf32, #tpu.memory_space<vmem>>, vector<2x8x128xf32>
      tpu.vector_store %arg5[%c0_20, %c0_21, %c0_22], %35 {strides = array<i32>} : memref<2x8x128xf32, #tpu.memory_space<vmem>>, vector<2x8x128xf32>,
    } else {
    }
    return
  }
  func.func @transform_0(%arg0: i32, %arg1: i32) -> (i32, i32, i32) {
    %c0_i32 = arith.constant 0 : i32
    %c0_i32_0 = arith.constant 0 : i32
    %c0_i32_1 = arith.constant 0 : i32
    return %arg0, %c0_i32, %c0_i32_0 : i32, i32, i32
  }
  func.func @transform_1(%arg0: i32, %arg1: i32) -> (i32, i32, i32) {
    %c0_i32 = arith.constant 0 : i32
    %c0_i32_0 = arith.constant 0 : i32
    %c0_i32_1 = arith.constant 0 : i32
    %c0_i32_2 = arith.constant 0 : i32
    return %c0_i32, %c0_i32_0, %c0_i32_1 : i32, i32, i32
  }
  func.func @transform_2(%arg0: i32, %arg1: i32) -> (i32, i32, i32) {
    %c0_i32 = arith.constant 0 : i32
    %c0_i32_0 = arith.constant 0 : i32
    %c0_i32_1 = arith.constant 0 : i32
    %c0_i32_2 = arith.constant 0 : i32
    return %c0_i32, %c0_i32_0, %c0_i32_1 : i32, i32, i32
  }
  func.func @transform_3(%arg0: i32, %arg1: i32) -> (i32, i32, i32) {
    %c0_i32 = arith.constant 0 : i32
    %c0_i32_0 = arith.constant 0 : i32
    %c0_i32_1 = arith.constant 0 : i32
    return %arg0, %c0_i32, %c0_i32_0 : i32, i32, i32
  }
}

</mosaic_0001>

<bundles_post_ra>
// kernel: tpu_custom_call.1
= control target key start
LH: loop header
LB: loop body
LE: loop exit
PB: predicated region body
PF: predicated region fallthrough
CT: control target
= control target key end

     0   :  { %v408_v1 = vmov 0.0   ;;  %vm409_vm0 = vmmov 0   ;;  %s481_s0 = inlined_call_operand.vmem [shape: bf16[2,8,128], index: 0, kind: input, shape index: {}]   ;;  %s482_s1 = inlined_call_operand.vmem [shape: bf16[1,128,64], index: 1, kind: input, shape index: {}]   ;;  %s483_s2 = inlined_call_operand.vmem [shape: bf16[1,64,128], index: 2, kind: input, shape index: {}]   ;;  %s484_s3 = inlined_call_operand.hbm [shape: f32[2,8,128], index: 3, kind: output, shape index: {}]  }
   0x1   :  { %v361_v0 = vld [vmem:[%s482_s1 + $0x38] sm:$0xff]   ;;  %322 = vmatprep.subr.bf16.mxu0 %v408_v1  ;;  %342 = vmatprep.subr.bf16.mxu1 %v408_v1  ;;  %v362_v2 = vld [vmem:[%s482_s1 + $0x30] sm:$0xff]   ;;  %v363_v3 = vld [vmem:[%s482_s1 + $0x28] sm:$0xff]  }
   0x2   :  { %323 = vmatpush3.bf16.msra.mxu0 %v361_v0  ;;  %338 = vmatprep.mubr.msk.bf16.mxu0 %vm409_vm0, %v408_v1  ;;  %v364_v4 = vld [vmem:[%s482_s1 + $0x20] sm:$0xff]  }
   0x3   :  { %324 = vmatprep.subr.bf16.mxu0 %v408_v1  ;;  %350 = vmatprep.mubr.msk.bf16.mxu1 %vm409_vm0, %v408_v1 }
   0x6   :  { %325 = vmatpush3.bf16.msra.mxu0 %v362_v2 }
   0x7   :  { %326 = vmatprep.subr.bf16.mxu0 %v408_v1 }
   0xa   :  { %327 = vmatpush3.bf16.msra.mxu0 %v363_v3 }
   0xb   :  { %328 = vmatprep.subr.bf16.mxu0 %v408_v1 }
   0xc   :  { %8 = vsyncpa [#allocation4], 0  ;;  %v365_v5 = vld [vmem:[%s482_s1 + $0x18] sm:$0xff]   ;;  %v366_v6 = vld [vmem:[%s482_s1 + $0x10] sm:$0xff]   ;;  %vm135_vm1 = vcmask 523264   ;;  %v410_v57 = vmov 32  }
   0xd   :  { %v367_v7 = vld [vmem:[%s482_s1 + $0x8] sm:$0xff]   ;;  %v368_v8 = vld [vmem:[%s482_s1] sm:$0xff]   ;;  %v370_v10 = vld [vmem:[%s483_s2 + $0x18] sm:$0xff]   ;;  %360 = vset.pattern.permute.xlu0 %v410_v57 }
   0xe   :  { %329 = vmatpush3.bf16.msra.mxu0 %v364_v4  ;;  %v369_v9 = vld [vmem:[%s481_s0] sm:$0xff]   ;;  %343 = vmatpush3.bf16.msra.mxu1 %v370_v10  ;;  %v371_v11 = vld [vmem:[%s483_s2 + $0x10] sm:$0xff]   ;;  %v372_v12 = vld [vmem:[%s483_s2 + $0x8] sm:$0xff]  }
   0xf   :  { %330 = vmatprep.subr.bf16.mxu0 %v408_v1  ;;  %344 = vmatprep.subr.bf16.mxu1 %v408_v1  ;;  %v373_v13 = vld [vmem:[%s483_s2] sm:$0xff]   ;;  %s411_s2 = smov [#allocation3]  }
  0x10   :  { %s283_s9 = sshll.u32 %s411_s2, 4  ;;  %s284_s9 = int_to_ptr.vmem [resolvable:$true] %s283_s9 }
  0x11   :  { %s386_s10 = scalar_lea.vmem %s284_s9, 256  ;;  %p391_p1 = scmp.lt.s32.totalorder %s284_s9, %s284_s9 }
  0x12   :  { %331 = vmatpush3.bf16.msra.mxu0 %v365_v5  ;;  %345 = vmatpush3.bf16.msra.mxu1 %v371_v11  ;;  %p387_p0 = scmp.ne.s32.totalorder %s284_s9, %s386_s10  ;;  %p392_p2 = scmp.lt.s32.totalorder %s386_s10, %s386_s10 }
  0x13   :  { %332 = vmatprep.subr.bf16.mxu0 %v408_v1  ;;  %346 = vmatprep.subr.bf16.mxu1 %v408_v1 }
  0x14   :  { %p393_p3 = por %p392_p2, %p391_p1 }
  0x16   :  { %333 = vmatpush3.bf16.msra.mxu0 %v366_v6  ;;  %347 = vmatpush3.bf16.msra.mxu1 %v372_v12  ;;  %p394_p4 = pnand %p393_p3, %p387_p0 }
  0x17   :  { %334 = vmatprep.subr.bf16.mxu0 %v408_v1  ;;  %348 = vmatprep.subr.bf16.mxu1 %v408_v1 }
  0x1a   :  { %335 = vmatpush3.bf16.msra.mxu0 %v367_v7  ;;  %349 = vmatpush3.bf16.msra.mxu1 %v373_v13 }
  0x1b   :  { %336 = vmatprep.subr.bf16.mxu0 %v408_v1 }
  0x1e   :  { %337 = vmatpush3.bf16.msra.mxu0 %v368_v8 }
  0x21   :  { %339 = vmatmul.mubr.bf16.vlgmr.msra.gmra.mxu0 %v369_v9 }
  0xe1   :  { %v128_v14 = vpop.f32.mrf.mxu0 }
  0xe2   :  { %v136_v15 = vsel %vm135_vm1, %v128_v14, -inf }
  0xe3   :  { %v137_v16 = vrot.slane %v136_v15, 4  ;;  %v340_v17 = vpop.f32.mrf.mxu0 }
  0xe5   :  { %v138_v18 = vmax.f32 %v136_v15, %v137_v16  ;;  %v131_v19 = vpop.f32.mrf.mxu0 }
  0xe6   :  { %v143_v20 = vsel %vm135_vm1, %v131_v19, -inf }
  0xe7   :  { %v139_v21 = vrot.slane %v138_v18, 2  ;;  %v144_v22 = vrot.slane %v143_v20, 4  ;;  %v341_v23 = vpop.f32.mrf.mxu0 }
  0xe9   :  { %v140_v24 = vmax.f32 %v138_v18, %v139_v21  ;;  %v145_v25 = vmax.f32 %v143_v20, %v144_v22 }
  0xeb   :  { %v141_v26 = vrot.slane %v140_v24, 1  ;;  %v146_v27 = vrot.slane %v145_v25, 2 }
  0xed   :  { %v142_v28 = vmax.f32 %v140_v24, %v141_v26  ;;  %v147_v29 = vmax.f32 %v145_v25, %v146_v27 }
  0xef   :  { %v150_v30 = vsub.f32 %v128_v14, %v142_v28  ;;  %v148_v31 = vrot.slane %v147_v29, 1 }
  0xf1   :  { %v152_v32 = vmul.f32 1.442695, %v150_v30  ;;  %v149_v33 = vmax.f32 %v147_v29, %v148_v31 }
  0xf3   :  { %374 = vpow2.f32 %v152_v32  ;;  %v151_v34 = vsub.f32 %v131_v19, %v149_v33 }
  0xf5   :  { %v154_v35 = vmul.f32 1.442695, %v151_v34 }
  0xf7   :  { %376 = vpow2.f32 %v154_v35 }
 0x100   :  { %v375_v36 = vpop.eup %374 }
 0x101   :  { %v156_v37 = vsel %vm135_vm1, %v375_v36, 0.0 }
 0x102   :  { %v157_v38 = vrot.slane %v156_v37, 4 }
 0x104   :  { %v377_v39 = vpop.eup %376  ;;  %v158_v40 = vadd.f32 %v157_v38, %v156_v37 }
 0x105   :  { %v163_v41 = vsel %vm135_vm1, %v377_v39, 0.0 }
 0x106   :  { %v159_v42 = vrot.slane %v158_v40, 2  ;;  %v164_v43 = vrot.slane %v163_v41, 4 }
 0x108   :  { %v160_v44 = vadd.f32 %v159_v42, %v158_v40  ;;  %v165_v45 = vadd.f32 %v164_v43, %v163_v41 }
 0x10a   :  { %v161_v46 = vrot.slane %v160_v44, 1  ;;  %v166_v47 = vrot.slane %v165_v45, 2 }
 0x10c   :  { %v162_v48 = vadd.f32 %v161_v46, %v160_v44  ;;  %v167_v49 = vadd.f32 %v166_v47, %v165_v45 }
 0x10e   :  { %v168_v50 = vrot.slane %v167_v49, 1  ;;  %378 = vrcp.f32 %v162_v48 }
 0x110   :  { %v169_v51 = vadd.f32 %v168_v50, %v167_v49 }
 0x112   :  { %380 = vrcp.f32 %v169_v51 }
 0x11b   :  { %v379_v52 = vpop.eup %378 }
 0x11c   :  { %v172_v54 = vmul.f32 %v379_v52, %v375_v36 }
 0x11f   :  { %v381_v53 = vpop.eup %380 }
 0x120   :  { %v173_v55 = vmul.f32 %v381_v53, %v377_v39 }
 0x122   :  { %v176_v56 = vpack.c.bf16 %v173_v55, %v172_v54 }
 0x124   :  { %351 = vmatmul.mubr.msk.bf16.vlgmr.msra.gmra.mxu1 %vm135_vm1, %v176_v56 }
 0x1e4   :  { %v246_v58 = vpop.f32.mrf.mxu1 }
 0x1e5   :  { %382 = vrcp.f32 %v246_v58 }
 0x1e6   :  { %v352_v59 = vpop.f32.mrf.mxu1 }
 0x1e8   :  { %v249_v60 = vpop.f32.mrf.mxu1 }
 0x1e9   :  { %384 = vrcp.f32 %v249_v60 }
 0x1ea   :  { %v353_v61 = vpop.f32.mrf.mxu1 }
 0x1f2   :  { %v383_v62 = vpop.eup %382 }
 0x1f3   :  { %266 = vperm.xlu0 %360, %v383_v62  }
 0x1f6   :  { %v385_v63 = vpop.eup %384 }
 0x1f7   :  { %271 = vperm.xlu0 %360, %v385_v63  }
 0x26e   :  { %v267_v0 = vpop.permute.xlu0 %266 }
 0x26f   :  { %v274_v1 = vmul.f32 %v267_v0, %v246_v58 }
 0x271   :  { %276 = vst [vmem:[#allocation3] sm:$0xff] %v274_v1 }
 0x272   :  { %v272_v2 = vpop.permute.xlu0 %271 }
 0x273   :  { %v275_v3 = vmul.f32 %v272_v2, %v249_v60 }
 0x275   :  { %277 = vst [vmem:[#allocation3 + $0x8] sm:$0xff] %v275_v3 }
 0x276   :  { %397 = shalt.err (!%p394_p4)
}
 0x277   :  { %s412_s11 = smov 128   ;;  %s413_s12 = smov 8  }
 0x278   :  { %289 = dma.vmem_to_hbm [thread:$0]  %s284_s9, 256, %s484_s3, [#allocation4], %s412_s11, %s412_s11, %s413_s12  }
 0x279   :  { %406 = dma.done.wait [#allocation4], 256  }
 0x27a   :  { %407 = vsyncadd [#allocation4], 4294967040 }
 0x27b   :  { %293 = vsyncpa [#allocation4], 1 }

</bundles_post_ra>
